<compile_context>
chip_gen: v7x
topology: tpu7x:2x2x1
jax: 0.10.0
libtpu: 0.0.40
codegen_flags: <defaults>
</compile_context>

<pallas_src>
import functools

import jax
import jax.numpy as jnp
from jax.experimental import pallas as pl
from jax.experimental.pallas import tpu as pltpu

_IN = 2
_HIDDEN = 4
_LANES = 128
# param packing (flat f32[17]); the 0.5 of the tanh-sigmoid identity is folded
# into w2 / b2 at pack time (scalar-only work in the wrapper):
#   w1[i, j] (i<2, j<4) at i*4 + j   -> [0, 8)
#   b1[j]               at 8 + j     -> [8, 12)
#   0.5 * w2[j]         at 12 + j    -> [12, 16)
#   0.5 * b2            at 16
_NPARAMS = _IN * _HIDDEN + _HIDDEN + _HIDDEN + 1


def _round_up(n, m):
    return ((n + m - 1) // m) * m


def _cdiv(a, b):
    return -(-a // b)


def _logreg_kernel(params_ref, x_ref, o_ref):
    # x_ref: (2, TILE_R, 128) VMEM block — batch packed dense on sublanes+lanes.
    x0 = x_ref[0]                                   # (TILE_R, 128)
    x1 = x_ref[1]                                   # (TILE_R, 128)

    # Unrolled hidden layer: lanes-wide VPU multiply-adds + relu; accumulator
    # is seeded by the first hidden term (no zeros/broadcast init).
    y = None
    for j in range(_HIDDEN):
        h = x0 * params_ref[j] + x1 * params_ref[_HIDDEN + j] + params_ref[2 * _HIDDEN + j]
        h = jnp.maximum(h, 0.0)
        t = h * params_ref[3 * _HIDDEN + j]         # w2 already scaled by 0.5
        y = t if y is None else y + t
    y = y + params_ref[16]                          # 0.5 * b2

    # sigmoid(z) == 0.5 * (tanh(z/2) + 1); the z/2 is pre-folded into params,
    # so this is one EUP tanh + 2 VPU ops per element.
    o_ref[...] = 0.5 * jnp.tanh(y) + 0.5


@functools.partial(jax.jit, static_argnames=("max_tile_rows", "min_grid_steps"))
def logistic_regression(x, w1, b1, w2, b2, *, max_tile_rows=4096, min_grid_steps=2):
    """x: (B, 2) f32; w1: (2, 4) (=weight.T); b1: (1, 4); w2: (4, 1); b2: (1, 1)."""
    B = x.shape[0]

    # Flat parameter vector for SMEM; fold the tanh-sigmoid 0.5 into layer 2.
    params = jnp.concatenate(
        [w1.reshape(-1), b1.reshape(-1), 0.5 * w2.reshape(-1), 0.5 * b2.reshape(-1)]
    ).astype(jnp.float32)
    assert params.shape[0] == _NPARAMS

    # ---- static tiling math (B is a static shape under jit) ----
    r0 = _cdiv(B, _LANES)                                # rows of 128 lanes needed
    n_steps = max(1, _cdiv(r0, max_tile_rows))
    if n_steps < min_grid_steps and r0 >= min_grid_steps * 8:
        n_steps = min_grid_steps                         # keep v7x's 2nd TC busy
    if n_steps > 1:
        n_steps = _round_up(n_steps, 2)                  # balance across 2 cores
    tile_r = _round_up(_cdiv(r0, n_steps), 8)            # sublane-dense tiles
    r = n_steps * tile_r                                 # overshoot < 8*n_steps rows
    b_pad = r * _LANES

    # Feature-major, sublane+lane dense layout: (2, R, 128).
    x_t = x.astype(jnp.float32).T                        # (2, B)
    if b_pad != B:
        x_t = jnp.pad(x_t, ((0, 0), (0, b_pad - B)))     # pad with zeros (benign)
    x_t = x_t.reshape(_IN, r, _LANES)

    out = pl.pallas_call(
        _logreg_kernel,
        out_shape=jax.ShapeDtypeStruct((r, _LANES), jnp.float32),
        grid=(n_steps,),
        in_specs=[
            # Whole flat param vector lives in SMEM; scalar reads in-kernel.
            pl.BlockSpec(memory_space=pltpu.MemorySpace.SMEM),
            # Streamed, double-buffered dense input tiles: (2, TILE_R, 128).
            pl.BlockSpec((_IN, tile_r, _LANES), lambda i: (0, i, 0)),
        ],
        # Dense output tiles: full (8,128)-aligned, unmasked stores.
        out_specs=pl.BlockSpec((tile_r, _LANES), lambda i: (i, 0)),
        compiler_params=pltpu.CompilerParams(
            dimension_semantics=("parallel",),            # shard batch across TCs
            vmem_limit_bytes=32 * 1024 * 1024,            # ~12 MiB used; safe on v5e/v6e/v7x
        ),
    )(params, x_t)

    # Back to PyTorch's (B, 1) output shape.
    return out.reshape(-1)[:B].reshape(B, 1)


if __name__ == "__main__":
    key = jax.random.PRNGKey(0)
    k_x, k_w1, k_b1, k_w2, k_b2 = jax.random.split(key, 5)

    B = 8
    x = jax.random.normal(k_x, (B, 2), dtype=jnp.float32)

    # Deterministic parameter init mimicking nn.Linear's uniform(-1/sqrt(in), 1/sqrt(in)).
    bound1 = 1.0 / jnp.sqrt(2.0)
    w1 = jax.random.uniform(k_w1, (2, 4), jnp.float32, -bound1, bound1)   # linear1.weight.T
    b1 = jax.random.uniform(k_b1, (1, 4), jnp.float32, -bound1, bound1)   # linear1.bias
    bound2 = 1.0 / jnp.sqrt(4.0)
    w2 = jax.random.uniform(k_w2, (4, 1), jnp.float32, -bound2, bound2)   # linear2.weight.T
    b2 = jax.random.uniform(k_b2, (1, 1), jnp.float32, -bound2, bound2)   # linear2.bias

    y = logistic_regression(x, w1, b1, w2, b2)
    jax.block_until_ready(y)

    # Reference check in plain JAX (module semantics).
    ref = jax.nn.sigmoid(jnp.maximum(x @ w1 + b1, 0.0) @ w2 + b2)
    assert y.shape == (B, 1)
    assert jnp.allclose(y, ref, atol=1e-5), "mismatch vs reference"
    print("KERNEL_OK")
</pallas_src>

<mosaic_0001>
module attributes {stable_mosaic.version = 11 : i64} {
  func.func @_logreg_kernel(%arg0: i32, %arg1: memref<17xf32, #tpu.memory_space<smem>>, %arg2: memref<2x8x128xf32, #tpu.memory_space<vmem>>, %arg3: memref<8x128xf32, #tpu.memory_space<vmem>>) attributes {dimension_semantics = [#tpu.dimension_semantics<parallel>], iteration_bounds = array<i64: 1>, scalar_prefetch = 0 : i64, scratch_operands = 0 : i64, tpu.core_type = #tpu.core_type<tc>, window_params = [{transform_indices = @transform_0, window_bounds = array<i64: 17>}, {transform_indices = @transform_1, window_bounds = array<i64: 2, 8, 128>}, {transform_indices = @transform_2, window_bounds = array<i64: 8, 128>}]} {
    %c0 = arith.constant 0 : index
    %c0_0 = arith.constant 0 : index
    %c0_1 = arith.constant 0 : index
    %0 = vector.load %arg2[%c0, %c0_0, %c0_1] : memref<2x8x128xf32, #tpu.memory_space<vmem>>, vector<1x8x128xf32>
    %1 = vector.shape_cast %0 : vector<1x8x128xf32> to vector<8x128xf32>
    %c1 = arith.constant 1 : index
    %c0_2 = arith.constant 0 : index
    %c0_3 = arith.constant 0 : index
    %2 = vector.load %arg2[%c1, %c0_2, %c0_3] : memref<2x8x128xf32, #tpu.memory_space<vmem>>, vector<1x8x128xf32>
    %3 = vector.shape_cast %2 : vector<1x8x128xf32> to vector<8x128xf32>
    %c0_4 = arith.constant 0 : index
    %4 = memref.load %arg1[%c0_4] : memref<17xf32, #tpu.memory_space<smem>>
    %5 = vector.broadcast %4 : f32 to vector<8x128xf32>
    %6 = arith.mulf %1, %5 : vector<8x128xf32>
    %c4 = arith.constant 4 : index
    %7 = memref.load %arg1[%c4] : memref<17xf32, #tpu.memory_space<smem>>
    %8 = vector.broadcast %7 : f32 to vector<8x128xf32>
    %9 = arith.mulf %3, %8 : vector<8x128xf32>
    %10 = arith.addf %6, %9 : vector<8x128xf32>
    %c8 = arith.constant 8 : index
    %11 = memref.load %arg1[%c8] : memref<17xf32, #tpu.memory_space<smem>>
    %12 = vector.broadcast %11 : f32 to vector<8x128xf32>
    %13 = arith.addf %10, %12 : vector<8x128xf32>
    %cst = arith.constant 0.000000e+00 : f32
    %14 = vector.broadcast %cst : f32 to vector<8x128xf32>
    %15 = arith.maximumf %13, %14 : vector<8x128xf32>
    %c12 = arith.constant 12 : index
    %16 = memref.load %arg1[%c12] : memref<17xf32, #tpu.memory_space<smem>>
    %17 = vector.broadcast %16 : f32 to vector<8x128xf32>
    %18 = arith.mulf %15, %17 : vector<8x128xf32>
    %c1_5 = arith.constant 1 : index
    %19 = memref.load %arg1[%c1_5] : memref<17xf32, #tpu.memory_space<smem>>
    %20 = vector.broadcast %19 : f32 to vector<8x128xf32>
    %21 = arith.mulf %1, %20 : vector<8x128xf32>
    %c5 = arith.constant 5 : index
    %22 = memref.load %arg1[%c5] : memref<17xf32, #tpu.memory_space<smem>>
    %23 = vector.broadcast %22 : f32 to vector<8x128xf32>
    %24 = arith.mulf %3, %23 : vector<8x128xf32>
    %25 = arith.addf %21, %24 : vector<8x128xf32>
    %c9 = arith.constant 9 : index
    %26 = memref.load %arg1[%c9] : memref<17xf32, #tpu.memory_space<smem>>
    %27 = vector.broadcast %26 : f32 to vector<8x128xf32>
    %28 = arith.addf %25, %27 : vector<8x128xf32>
    %cst_6 = arith.constant 0.000000e+00 : f32
    %29 = vector.broadcast %cst_6 : f32 to vector<8x128xf32>
    %30 = arith.maximumf %28, %29 : vector<8x128xf32>
    %c13 = arith.constant 13 : index
    %31 = memref.load %arg1[%c13] : memref<17xf32, #tpu.memory_space<smem>>
    %32 = vector.broadcast %31 : f32 to vector<8x128xf32>
    %33 = arith.mulf %30, %32 : vector<8x128xf32>
    %34 = arith.addf %18, %33 : vector<8x128xf32>
    %c2 = arith.constant 2 : index
    %35 = memref.load %arg1[%c2] : memref<17xf32, #tpu.memory_space<smem>>
    %36 = vector.broadcast %35 : f32 to vector<8x128xf32>
    %37 = arith.mulf %1, %36 : vector<8x128xf32>
    %c6 = arith.constant 6 : index
    %38 = memref.load %arg1[%c6] : memref<17xf32, #tpu.memory_space<smem>>
    %39 = vector.broadcast %38 : f32 to vector<8x128xf32>
    %40 = arith.mulf %3, %39 : vector<8x128xf32>
    %41 = arith.addf %37, %40 : vector<8x128xf32>
    %c10 = arith.constant 10 : index
    %42 = memref.load %arg1[%c10] : memref<17xf32, #tpu.memory_space<smem>>
    %43 = vector.broadcast %42 : f32 to vector<8x128xf32>
    %44 = arith.addf %41, %43 : vector<8x128xf32>
    %cst_7 = arith.constant 0.000000e+00 : f32
    %45 = vector.broadcast %cst_7 : f32 to vector<8x128xf32>
    %46 = arith.maximumf %44, %45 : vector<8x128xf32>
    %c14 = arith.constant 14 : index
    %47 = memref.load %arg1[%c14] : memref<17xf32, #tpu.memory_space<smem>>
    %48 = vector.broadcast %47 : f32 to vector<8x128xf32>
    %49 = arith.mulf %46, %48 : vector<8x128xf32>
    %50 = arith.addf %34, %49 : vector<8x128xf32>
    %c3 = arith.constant 3 : index
    %51 = memref.load %arg1[%c3] : memref<17xf32, #tpu.memory_space<smem>>
    %52 = vector.broadcast %51 : f32 to vector<8x128xf32>
    %53 = arith.mulf %1, %52 : vector<8x128xf32>
    %c7 = arith.constant 7 : index
    %54 = memref.load %arg1[%c7] : memref<17xf32, #tpu.memory_space<smem>>
    %55 = vector.broadcast %54 : f32 to vector<8x128xf32>
    %56 = arith.mulf %3, %55 : vector<8x128xf32>
    %57 = arith.addf %53, %56 : vector<8x128xf32>
    %c11 = arith.constant 11 : index
    %58 = memref.load %arg1[%c11] : memref<17xf32, #tpu.memory_space<smem>>
    %59 = vector.broadcast %58 : f32 to vector<8x128xf32>
    %60 = arith.addf %57, %59 : vector<8x128xf32>
    %cst_8 = arith.constant 0.000000e+00 : f32
    %61 = vector.broadcast %cst_8 : f32 to vector<8x128xf32>
    %62 = arith.maximumf %60, %61 : vector<8x128xf32>
    %c15 = arith.constant 15 : index
    %63 = memref.load %arg1[%c15] : memref<17xf32, #tpu.memory_space<smem>>
    %64 = vector.broadcast %63 : f32 to vector<8x128xf32>
    %65 = arith.mulf %62, %64 : vector<8x128xf32>
    %66 = arith.addf %50, %65 : vector<8x128xf32>
    %c16 = arith.constant 16 : index
    %67 = memref.load %arg1[%c16] : memref<17xf32, #tpu.memory_space<smem>>
    %68 = vector.broadcast %67 : f32 to vector<8x128xf32>
    %69 = arith.addf %66, %68 : vector<8x128xf32>
    %70 = math.tanh %69 : vector<8x128xf32>
    %cst_9 = arith.constant 5.000000e-01 : f32
    %71 = vector.broadcast %cst_9 : f32 to vector<8x128xf32>
    %72 = arith.mulf %71, %70 : vector<8x128xf32>
    %cst_10 = arith.constant 5.000000e-01 : f32
    %73 = vector.broadcast %cst_10 : f32 to vector<8x128xf32>
    %74 = arith.addf %72, %73 : vector<8x128xf32>
    %c0_11 = arith.constant 0 : index
    %c0_12 = arith.constant 0 : index
    %75 = vector.load %arg3[%c0_11, %c0_12] : memref<8x128xf32, #tpu.memory_space<vmem>>, vector<8x128xf32>
    tpu.vector_store %arg3[%c0_11, %c0_12], %74 {strides = array<i32>} : memref<8x128xf32, #tpu.memory_space<vmem>>, vector<8x128xf32>,
    return
  }
  func.func @transform_0(%arg0: i32) -> i32 {
    %c0_i32 = arith.constant 0 : i32
    %c0_i32_0 = arith.constant 0 : i32
    return %c0_i32 : i32
  }
  func.func @transform_1(%arg0: i32) -> (i32, i32, i32) {
    %c0_i32 = arith.constant 0 : i32
    %c0_i32_0 = arith.constant 0 : i32
    %c0_i32_1 = arith.constant 0 : i32
    return %c0_i32, %arg0, %c0_i32_0 : i32, i32, i32
  }
  func.func @transform_2(%arg0: i32) -> (i32, i32) {
    %c0_i32 = arith.constant 0 : i32
    %c0_i32_0 = arith.constant 0 : i32
    return %arg0, %c0_i32 : i32, i32
  }
}

</mosaic_0001>

<bundles_post_ra>
// kernel: logistic_regression.1
= control target key start
LH: loop header
LB: loop body
LE: loop exit
PB: predicated region body
PF: predicated region fallthrough
CT: control target
= control target key end

     0   :  { %7 = vsyncpa [#allocation3], 0  ;;  %s178_s0 = inlined_call_operand.vmem [shape: f32[17], index: 0, kind: input, shape index: {}]   ;;  %s179_s1 = inlined_call_operand.vmem [shape: f32[2,8,128], index: 1, kind: input, shape index: {}]   ;;  %s180_s2 = inlined_call_operand.vmem [shape: f32[8,128], index: 2, kind: output, shape index: {}]  }
   0x1   :  { %s14_s11 = sshll.u32 %s178_s0, 4  ;;  %s15_s11 = int_to_ptr.vmem [resolvable:$true] %s14_s11 }
   0x2   :  { %s118_s12 = scalar_lea.vmem %s15_s11, 16  ;;  %p123_p1 = scmp.lt.s32.totalorder %s15_s11, %s15_s11 }
   0x3   :  { %p119_p0 = scmp.ne.s32.totalorder %s15_s11, %s118_s12  ;;  %p124_p2 = scmp.lt.s32.totalorder %s118_s12, %s118_s12 }
   0x5   :  { %p125_p3 = por %p124_p2, %p123_p1 }
   0x7   :  { %p126_p4 = pnand %p125_p3, %p119_p0 }
   0x9   :  { %129 = shalt.err (!%p126_p4)
}
   0xa   :  { %s132_s13 = smov [#allocation2]  }
   0xb   :  { %17 = dma.vmem_to_smem %s15_s11, 16, %s132_s13, [#allocation3]  }
   0xc   :  { %130 = dma.done.wait [#allocation3], 16  }
   0xd   :  { %131 = vsyncadd [#allocation3], 4294967280 }
   0xe   :  { %23 = sfence }
   0xf   :  { %s27_s14 = sld [smem:[#allocation2]]  ;;  %s99_s15 = sld [smem:[#allocation2 + $0x4]]  ;;  %v24_v0 = vld [vmem:[%s179_s1] sm:$0xff]  ;;  %v98_v1 = vld [vmem:[%s179_s1 + $0x8] sm:$0xff] }
  0x10   :  { %s100_s16 = sld [smem:[#allocation2 + $0x8]]  ;;  %s102_s17 = sld [smem:[#allocation2 + $0x1]] }
  0x11   :  { %s103_s18 = sld [smem:[#allocation2 + $0x5]]  ;;  %s151_s19 = sld [smem:[#allocation2 + $0xc]] }
  0x12   :  { %s153_s0 = sld [smem:[#allocation2 + $0x9]]  ;;  %s106_s24 = sld [smem:[#allocation2 + $0x2]] }
  0x13   :  { %s107_s25 = sld [smem:[#allocation2 + $0x6]]  ;;  %s161_s26 = sld [smem:[#allocation2 + $0xd]] }
  0x14   :  { %s163_s27 = sld [smem:[#allocation2 + $0xa]]  ;;  %s110_s28 = sld [smem:[#allocation2 + $0x3]] }
  0x15   :  { %v28_v2 = vstv %s27_s14  ;;  %v31_v3 = vstv %s99_s15  ;;  %s111_s29 = sld [smem:[#allocation2 + $0x7]]  ;;  %s165_s30 = sld [smem:[#allocation2 + $0xb]] }
  0x16   :  { %v29_v4 = vmul.f32 %v28_v2, %v24_v0  ;;  %v32_v5 = vmul.f32 %v98_v1, %v31_v3  ;;  %v35_v6 = vstv %s100_s16  ;;  %v42_v7 = vstv %s102_s17  ;;  %s167_s1 = sld [smem:[#allocation2 + $0xe]]  ;;  %s113_s3 = sld [smem:[#allocation2 + $0xf]] }
  0x17   :  { %v45_v8 = vstv %s103_s18  ;;  %v43_v10 = vmul.f32 %v42_v7, %v24_v0  ;;  %v39_v19 = vstv %s151_s19  ;;  %s114_s4 = sld [smem:[#allocation2 + $0x10]] }
  0x18   :  { %v33_v9 = vadd.f32 %v32_v5, %v29_v4  ;;  %v46_v11 = vmul.f32 %v98_v1, %v45_v8  ;;  %v49_v12 = vstv %s153_s0  ;;  %v57_v13 = vstv %s106_s24 }
  0x19   :  { %v60_v14 = vstv %s107_s25  ;;  %v58_v17 = vmul.f32 %v57_v13, %v24_v0  ;;  %v53_v27 = vstv %s161_s26 }
  0x1a   :  { %v36_v15 = vadd.f32 %v35_v6, %v33_v9  ;;  %v47_v16 = vadd.f32 %v46_v11, %v43_v10  ;;  %v61_v18 = vmul.f32 %v98_v1, %v60_v14  ;;  %v64_v20 = vstv %s163_s27 }
  0x1b   :  { %v72_v21 = vstv %s110_s28  ;;  %v75_v22 = vstv %s111_s29  ;;  %v79_v32 = vstv %s165_s30 }
  0x1c   :  { %v37_v23 = vmax.f32 %v36_v15, 0.0  ;;  %v50_v24 = vadd.f32 %v49_v12, %v47_v16  ;;  %v62_v25 = vadd.f32 %v61_v18, %v58_v17  ;;  %v73_v26 = vmul.f32 %v72_v21, %v24_v0 }
  0x1d   :  { %v76_v28 = vmul.f32 %v98_v1, %v75_v22  ;;  %v68_v33 = vstv %s167_s1  ;;  %v83_v40 = vstv %s113_s3  ;;  %v87_v44 = vstv %s114_s4 }
  0x1e   :  { %v40_v29 = vmul.f32 %v39_v19, %v37_v23  ;;  %v51_v30 = vmax.f32 %v50_v24, 0.0  ;;  %v65_v31 = vadd.f32 %v64_v20, %v62_v25 }
  0x1f   :  { %v77_v34 = vadd.f32 %v76_v28, %v73_v26 }
  0x20   :  { %v54_v35 = vmul.f32 %v53_v27, %v51_v30  ;;  %v66_v36 = vmax.f32 %v65_v31, 0.0 }
  0x21   :  { %v80_v37 = vadd.f32 %v79_v32, %v77_v34 }
  0x22   :  { %v55_v38 = vadd.f32 %v54_v35, %v40_v29  ;;  %v69_v39 = vmul.f32 %v68_v33, %v66_v36 }
  0x23   :  { %v81_v41 = vmax.f32 %v80_v37, 0.0 }
  0x24   :  { %v70_v42 = vadd.f32 %v69_v39, %v55_v38 }
  0x25   :  { %v84_v43 = vmul.f32 %v83_v40, %v81_v41 }
  0x27   :  { %v85_v45 = vadd.f32 %v84_v43, %v70_v42 }
  0x29   :  { %v88_v46 = vadd.f32 %v87_v44, %v85_v45 }
  0x2b   :  { %116 = vtanh.f32 %v88_v46 }
  0x35   :  { %v117_v47 = vpop.eup %116 }
  0x36   :  { %v90_v48 = vmul.f32 0.5, %v117_v47 }
  0x38   :  { %v91_v49 = vadd.f32 0.5, %v90_v48 }
  0x3a   :  { %92 = vst [vmem:[%s180_s2] sm:$0xff] %v91_v49 }
  0x3b   :  { %97 = vsyncpa [#allocation3], 1 }

</bundles_post_ra>
